<compile_context>
chip_gen: v6e
topology: v6e:2x2x1
jax: 0.10.0
libtpu: 0.0.40
codegen_flags: <defaults>
</compile_context>

<pallas_src>
import functools

import jax
import jax.numpy as jnp
from jax import lax
from jax.experimental import pallas as pl
from jax.experimental.pallas import tpu as pltpu

LANE = 128          # vreg lane width
MAX_TB = 1024       # max batch rows per grid step (multiple of 8)


def _round_up(n, m):
    return ((n + m - 1) // m) * m


def _policy_net_kernel(x_ref, w1_ref, b1_ref, w2_ref, b2_ref, out_ref, *, out_size):
    # x_ref: (TB, D_pad) f32, weights padded to 128-multiples, out_ref: (TB, O_pad).
    x = x_ref[...]

    # fc1: full-width MXU pass; zero-padded K/N columns are numerically exact.
    h = jnp.dot(x, w1_ref[...], preferred_element_type=jnp.float32)
    h = h + b1_ref[...]                                   # broadcast (1, H_pad)

    # leaky_relu, negative_slope = 0.01 (F.leaky_relu default); leaky_relu(0) == 0,
    # so padded hidden lanes stay exactly zero.
    h = jnp.where(h > 0, h, 0.01 * h)

    # fc2: padded rows of w2 are zero -> padded hidden lanes contribute nothing.
    logits = jnp.dot(h, w2_ref[...], preferred_element_type=jnp.float32)
    logits = logits + b2_ref[...]                         # broadcast (1, O_pad)

    # Mask padded output lanes before the reductions so they don't perturb log_softmax.
    col = lax.broadcasted_iota(jnp.int32, logits.shape, 1)
    masked = jnp.where(col < out_size, logits, jnp.float32(-1e30))

    # Numerically stable log_softmax over one lane-aligned 128-wide vreg row.
    m = jnp.max(masked, axis=-1, keepdims=True)
    shifted = masked - m
    lse = jnp.log(jnp.sum(jnp.exp(shifted), axis=-1, keepdims=True))
    out_ref[...] = (shifted - lse).astype(out_ref.dtype)  # lane-dense (TB, 128) store


@jax.jit
def policy_net_v2_forward(x, w1, b1, w2, b2):
    """x: (B, D) f32; w1: (D, H); b1: (1, H); w2: (H, O); b2: (1, O).  Returns (B, O) log-probs."""
    B, D = x.shape
    H = w1.shape[1]
    O = w2.shape[1]

    D_pad = _round_up(max(D, 1), LANE)
    H_pad = _round_up(max(H, 1), LANE)
    O_pad = _round_up(max(O, 1), LANE)

    TB = min(MAX_TB, _round_up(max(B, 1), 8))
    B_pad = _round_up(max(B, 1), TB)

    # Host-side zero padding (exact for fc1/fc2; padded logit lanes are masked in-kernel).
    xp = jnp.zeros((B_pad, D_pad), jnp.float32).at[:B, :D].set(x.astype(jnp.float32))
    w1p = jnp.zeros((D_pad, H_pad), jnp.float32).at[:D, :H].set(w1.astype(jnp.float32))
    b1p = jnp.zeros((1, H_pad), jnp.float32).at[:, :H].set(b1.reshape(1, H).astype(jnp.float32))
    w2p = jnp.zeros((H_pad, O_pad), jnp.float32).at[:H, :O].set(w2.astype(jnp.float32))
    b2p = jnp.zeros((1, O_pad), jnp.float32).at[:, :O].set(b2.reshape(1, O).astype(jnp.float32))

    kernel = functools.partial(_policy_net_kernel, out_size=O)

    out_padded = pl.pallas_call(
        kernel,
        out_shape=jax.ShapeDtypeStruct((B_pad, O_pad), jnp.float32),
        grid=(B_pad // TB,),
        in_specs=[
            pl.BlockSpec((TB, D_pad), lambda i: (i, 0)),       # x tile (pipelined)
            pl.BlockSpec((D_pad, H_pad), lambda i: (0, 0)),    # w1 (VMEM-resident)
            pl.BlockSpec((1, H_pad), lambda i: (0, 0)),        # b1
            pl.BlockSpec((H_pad, O_pad), lambda i: (0, 0)),    # w2
            pl.BlockSpec((1, O_pad), lambda i: (0, 0)),        # b2
        ],
        out_specs=pl.BlockSpec((TB, O_pad), lambda i: (i, 0)), # lane-dense output tile
        compiler_params=pltpu.CompilerParams(
            dimension_semantics=("parallel",),                 # shard batch across TCs (v7x)
        ),
    )(xp, w1p, b1p, w2p, b2p)

    return out_padded[:B, :O]


def init_policy_net_params(key, input_size, output_size, hidden_size=50):
    """Deterministic init mirroring nn.Linear's U(-1/sqrt(fan_in), 1/sqrt(fan_in))."""
    k1, k2, k3, k4 = jax.random.split(key, 4)
    bound1 = 1.0 / jnp.sqrt(jnp.float32(input_size))
    bound2 = 1.0 / jnp.sqrt(jnp.float32(hidden_size))
    w1 = jax.random.uniform(k1, (input_size, hidden_size), jnp.float32, -bound1, bound1)
    b1 = jax.random.uniform(k2, (1, hidden_size), jnp.float32, -bound1, bound1)
    w2 = jax.random.uniform(k3, (hidden_size, output_size), jnp.float32, -bound2, bound2)
    b2 = jax.random.uniform(k4, (1, output_size), jnp.float32, -bound2, bound2)
    return w1, b1, w2, b2


def _reference_forward(x, w1, b1, w2, b2):
    h = x @ w1 + b1
    h = jnp.where(h > 0, h, 0.01 * h)
    logits = h @ w2 + b2
    return jax.nn.log_softmax(logits, axis=-1)


if __name__ == "__main__":
    B, INPUT_SIZE, HIDDEN_SIZE, OUTPUT_SIZE = 8, 32, 50, 8

    key = jax.random.PRNGKey(0)
    kx, kp = jax.random.split(key)
    x = jax.random.normal(kx, (B, INPUT_SIZE), jnp.float32)
    w1, b1, w2, b2 = init_policy_net_params(kp, INPUT_SIZE, OUTPUT_SIZE, HIDDEN_SIZE)

    out = policy_net_v2_forward(x, w1, b1, w2, b2)
    out = jax.block_until_ready(out)

    ref = _reference_forward(x, w1, b1, w2, b2)
    assert out.shape == (B, OUTPUT_SIZE), out.shape
    assert jnp.allclose(out, ref, atol=1e-5, rtol=1e-5), "mismatch vs. reference"

    # Also exercise a larger batch to check the grid path (multiple tiles).
    B2 = 2500
    x2 = jax.random.normal(jax.random.PRNGKey(1), (B2, INPUT_SIZE), jnp.float32)
    out2 = jax.block_until_ready(policy_net_v2_forward(x2, w1, b1, w2, b2))
    ref2 = _reference_forward(x2, w1, b1, w2, b2)
    assert out2.shape == (B2, OUTPUT_SIZE)
    assert jnp.allclose(out2, ref2, atol=1e-5, rtol=1e-5), "mismatch vs. reference (large batch)"

    print("KERNEL_OK")
</pallas_src>

<mosaic_0001>
module attributes {stable_mosaic.version = 11 : i64} {
  func.func @_policy_net_kernel(%arg0: i32, %arg1: memref<8x128xf32, #tpu.memory_space<vmem>>, %arg2: memref<128x128xf32, #tpu.memory_space<vmem>>, %arg3: memref<1x128xf32, #tpu.memory_space<vmem>>, %arg4: memref<128x128xf32, #tpu.memory_space<vmem>>, %arg5: memref<1x128xf32, #tpu.memory_space<vmem>>, %arg6: memref<8x128xf32, #tpu.memory_space<vmem>>) attributes {dimension_semantics = [#tpu.dimension_semantics<parallel>], iteration_bounds = array<i64: 1>, scalar_prefetch = 0 : i64, scratch_operands = 0 : i64, tpu.core_type = #tpu.core_type<tc>, window_params = [{transform_indices = @transform_0, window_bounds = array<i64: 8, 128>}, {pipeline_mode = #tpu.pipeline_mode<synchronous>, transform_indices = @transform_1, window_bounds = array<i64: 128, 128>}, {pipeline_mode = #tpu.pipeline_mode<synchronous>, transform_indices = @transform_2, window_bounds = array<i64: 1, 128>}, {pipeline_mode = #tpu.pipeline_mode<synchronous>, transform_indices = @transform_3, window_bounds = array<i64: 128, 128>}, {pipeline_mode = #tpu.pipeline_mode<synchronous>, transform_indices = @transform_4, window_bounds = array<i64: 1, 128>}, {transform_indices = @transform_5, window_bounds = array<i64: 8, 128>}]} {
    %c0 = arith.constant 0 : index
    %c0_0 = arith.constant 0 : index
    %0 = vector.load %arg1[%c0, %c0_0] : memref<8x128xf32, #tpu.memory_space<vmem>>, vector<8x128xf32>
    %c0_1 = arith.constant 0 : index
    %c0_2 = arith.constant 0 : index
    %1 = vector.load %arg2[%c0_1, %c0_2] : memref<128x128xf32, #tpu.memory_space<vmem>>, vector<128x128xf32>
    %cst = arith.constant dense<0.000000e+00> : vector<8x128xf32>
    %2 = tpu.matmul %0, %1, %cst {dimension_numbers = #tpu.dot_dimension_numbers<[1], [0], [0], [1], [0, 0, 1, 1], [], []>} : vector<8x128xf32>, vector<128x128xf32>, vector<8x128xf32> -> vector<8x128xf32>
    %c0_3 = arith.constant 0 : index
    %c0_4 = arith.constant 0 : index
    %3 = vector.load %arg3[%c0_3, %c0_4] : memref<1x128xf32, #tpu.memory_space<vmem>>, vector<1x128xf32>
    %4 = vector.broadcast %3 : vector<1x128xf32> to vector<8x128xf32>
    %5 = arith.addf %2, %4 : vector<8x128xf32>
    %cst_5 = arith.constant 0.000000e+00 : f32
    %6 = vector.broadcast %cst_5 : f32 to vector<8x128xf32>
    %7 = arith.cmpf ogt, %5, %6 : vector<8x128xf32>
    %cst_6 = arith.constant 0.00999999977 : f32
    %8 = vector.broadcast %cst_6 : f32 to vector<8x128xf32>
    %9 = arith.mulf %8, %5 : vector<8x128xf32>
    %10 = arith.select %7, %5, %9 : vector<8x128xi1>, vector<8x128xf32>
    %c0_7 = arith.constant 0 : index
    %c0_8 = arith.constant 0 : index
    %11 = vector.load %arg4[%c0_7, %c0_8] : memref<128x128xf32, #tpu.memory_space<vmem>>, vector<128x128xf32>
    %cst_9 = arith.constant dense<0.000000e+00> : vector<8x128xf32>
    %12 = tpu.matmul %10, %11, %cst_9 {dimension_numbers = #tpu.dot_dimension_numbers<[1], [0], [0], [1], [0, 0, 1, 1], [], []>} : vector<8x128xf32>, vector<128x128xf32>, vector<8x128xf32> -> vector<8x128xf32>
    %c0_10 = arith.constant 0 : index
    %c0_11 = arith.constant 0 : index
    %13 = vector.load %arg5[%c0_10, %c0_11] : memref<1x128xf32, #tpu.memory_space<vmem>>, vector<1x128xf32>
    %14 = vector.broadcast %13 : vector<1x128xf32> to vector<8x128xf32>
    %15 = arith.addf %12, %14 : vector<8x128xf32>
    %16 = tpu.iota {dimensions = array<i32: 1>} : vector<8x128xi32>
    %c8_i32 = arith.constant 8 : i32
    %17 = vector.broadcast %c8_i32 : i32 to vector<8x128xi32>
    %18 = arith.cmpi slt, %16, %17 : vector<8x128xi32>
    %cst_12 = arith.constant -1.000000e+30 : f32
    %19 = vector.broadcast %cst_12 : f32 to vector<8x128xf32>
    %20 = arith.select %18, %15, %19 : vector<8x128xi1>, vector<8x128xf32>
    %cst_13 = arith.constant dense<0xFF800000> : vector<8xf32>
    %21 = vector.multi_reduction <maximumf>, %20, %cst_13 [1] : vector<8x128xf32> to vector<8xf32>
    %22 = vector.shape_cast %21 : vector<8xf32> to vector<8x1xf32>
    %23 = vector.broadcast %22 : vector<8x1xf32> to vector<8x128xf32>
    %24 = arith.subf %20, %23 : vector<8x128xf32>
    %25 = math.exp %24 : vector<8x128xf32>
    %cst_14 = arith.constant dense<0.000000e+00> : vector<8xf32>
    %26 = vector.multi_reduction <add>, %25, %cst_14 [1] : vector<8x128xf32> to vector<8xf32>
    %27 = vector.shape_cast %26 : vector<8xf32> to vector<8x1xf32>
    %28 = math.log %27 : vector<8x1xf32>
    %29 = vector.broadcast %28 : vector<8x1xf32> to vector<8x128xf32>
    %30 = arith.subf %24, %29 : vector<8x128xf32>
    %c0_15 = arith.constant 0 : index
    %c0_16 = arith.constant 0 : index
    %31 = vector.load %arg6[%c0_15, %c0_16] : memref<8x128xf32, #tpu.memory_space<vmem>>, vector<8x128xf32>
    tpu.vector_store %arg6[%c0_15, %c0_16], %30 {strides = array<i32>} : memref<8x128xf32, #tpu.memory_space<vmem>>, vector<8x128xf32>,
    return
  }
  func.func @transform_0(%arg0: i32) -> (i32, i32) {
    %c0_i32 = arith.constant 0 : i32
    %c0_i32_0 = arith.constant 0 : i32
    return %arg0, %c0_i32 : i32, i32
  }
  func.func @transform_1(%arg0: i32) -> (i32, i32) {
    %c0_i32 = arith.constant 0 : i32
    %c0_i32_0 = arith.constant 0 : i32
    %c0_i32_1 = arith.constant 0 : i32
    return %c0_i32, %c0_i32_0 : i32, i32
  }
  func.func @transform_2(%arg0: i32) -> (i32, i32) {
    %c0_i32 = arith.constant 0 : i32
    %c0_i32_0 = arith.constant 0 : i32
    %c0_i32_1 = arith.constant 0 : i32
    return %c0_i32, %c0_i32_0 : i32, i32
  }
  func.func @transform_3(%arg0: i32) -> (i32, i32) {
    %c0_i32 = arith.constant 0 : i32
    %c0_i32_0 = arith.constant 0 : i32
    %c0_i32_1 = arith.constant 0 : i32
    return %c0_i32, %c0_i32_0 : i32, i32
  }
  func.func @transform_4(%arg0: i32) -> (i32, i32) {
    %c0_i32 = arith.constant 0 : i32
    %c0_i32_0 = arith.constant 0 : i32
    %c0_i32_1 = arith.constant 0 : i32
    return %c0_i32, %c0_i32_0 : i32, i32
  }
  func.func @transform_5(%arg0: i32) -> (i32, i32) {
    %c0_i32 = arith.constant 0 : i32
    %c0_i32_0 = arith.constant 0 : i32
    return %arg0, %c0_i32 : i32, i32
  }
}

</mosaic_0001>

<bundles_post_ra>
// kernel: policy_net_v2_forward.1
= control target key start
LH: loop header
LB: loop body
LE: loop exit
PB: predicated region body
PF: predicated region fallthrough
CT: control target
= control target key end

     0   :  { %v375_v1 = vmov 0.0   ;;  %vm376_vm0 = vmmov 0   ;;  %s550_s0 = inlined_call_operand.vmem [shape: f32[8,128], index: 0, kind: input, shape index: {}]   ;;  %s551_s1 = inlined_call_operand.vmem [shape: f32[128,128], index: 1, kind: input, shape index: {}]   ;;  %s552_s2 = inlined_call_operand.vmem [shape: f32[1,128], index: 2, kind: input, shape index: {}]   ;;  %s553_s3 = inlined_call_operand.vmem [shape: f32[128,128], index: 3, kind: input, shape index: {}]   ;;  %s554_s4 = inlined_call_operand.vmem [shape: f32[1,128], index: 4, kind: input, shape index: {}]   ;;  %s555_s5 = inlined_call_operand.hbm [shape: f32[8,128], index: 5, kind: output, shape index: {}]  }
   0x1   :  { %v37_v0 = vld [vmem:[%s551_s1 + $0x78] sm:$0xff]  ;;  %276 = vmatprep.subr.mxu0 %v375_v1  ;;  %v36_v2 = vld [vmem:[%s551_s1 + $0x70] sm:$0xff]  ;;  %308 = vmatprep.mubr.msk.f32.mxu0 %vm376_vm0, %v375_v1  ;;  %v35_v3 = vld [vmem:[%s551_s1 + $0x68] sm:$0xff] }
   0x2   :  { %277 = vmatpush3.msra.mxu0 %v37_v0  ;;  %311 = vmatprep.subr.mxu1 %v375_v1  ;;  %v34_v4 = vld [vmem:[%s551_s1 + $0x60] sm:$0xff]  ;;  %v133_v5 = vld [vmem:[%s553_s3 + $0x78] sm:$0xff]  ;;  %v132_v6 = vld [vmem:[%s553_s3 + $0x70] sm:$0xff] }
   0x3   :  { %278 = vmatprep.subr.mxu0 %v375_v1  ;;  %343 = vmatprep.mubr.msk.f32.mxu1 %vm376_vm0, %v375_v1  ;;  %v33_v7 = vld [vmem:[%s551_s1 + $0x58] sm:$0xff]  ;;  %v131_v8 = vld [vmem:[%s553_s3 + $0x68] sm:$0xff]  ;;  %v32_v9 = vld [vmem:[%s551_s1 + $0x50] sm:$0xff] }
   0x4   :  { %279 = vmatpush3.msra.mxu0 %v36_v2  ;;  %312 = vmatpush3.msra.mxu1 %v133_v5  ;;  %v130_v10 = vld [vmem:[%s553_s3 + $0x60] sm:$0xff] }
   0x5   :  { %280 = vmatprep.subr.mxu0 %v375_v1  ;;  %313 = vmatprep.subr.mxu1 %v375_v1 }
   0x6   :  { %281 = vmatpush3.msra.mxu0 %v35_v3  ;;  %314 = vmatpush3.msra.mxu1 %v132_v6 }
   0x7   :  { %282 = vmatprep.subr.mxu0 %v375_v1  ;;  %315 = vmatprep.subr.mxu1 %v375_v1 }
   0x8   :  { %283 = vmatpush3.msra.mxu0 %v34_v4  ;;  %316 = vmatpush3.msra.mxu1 %v131_v8 }
   0x9   :  { %284 = vmatprep.subr.mxu0 %v375_v1 }
   0xa   :  { %285 = vmatpush3.msra.mxu0 %v33_v7 }
   0xb   :  { %10 = vsyncpa [#allocation3], 0  ;;  %286 = vmatprep.subr.mxu0 %v375_v1  ;;  %v31_v11 = vld [vmem:[%s551_s1 + $0x48] sm:$0xff]  ;;  %317 = vmatprep.subr.mxu1 %v375_v1  ;;  %v129_v12 = vld [vmem:[%s553_s3 + $0x58] sm:$0xff]  ;;  %v211_v40 = vlaneseq }
   0xc   :  { %287 = vmatpush3.msra.mxu0 %v32_v9  ;;  %318 = vmatpush3.msra.mxu1 %v130_v10  ;;  %v30_v13 = vld [vmem:[%s551_s1 + $0x40] sm:$0xff]  ;;  %v128_v14 = vld [vmem:[%s553_s3 + $0x50] sm:$0xff]  ;;  %v29_v15 = vld [vmem:[%s551_s1 + $0x38] sm:$0xff] }
   0xd   :  { %288 = vmatprep.subr.mxu0 %v375_v1  ;;  %319 = vmatprep.subr.mxu1 %v375_v1  ;;  %v127_v16 = vld [vmem:[%s553_s3 + $0x48] sm:$0xff]  ;;  %v28_v17 = vld [vmem:[%s551_s1 + $0x30] sm:$0xff]  ;;  %v126_v18 = vld [vmem:[%s553_s3 + $0x40] sm:$0xff]  ;;  %v212_v41 = vand.u32 127, %v211_v40 }
   0xe   :  { %289 = vmatpush3.msra.mxu0 %v31_v11  ;;  %320 = vmatpush3.msra.mxu1 %v129_v12  ;;  %v27_v19 = vld [vmem:[%s551_s1 + $0x28] sm:$0xff]  ;;  %v125_v20 = vld [vmem:[%s553_s3 + $0x38] sm:$0xff]  ;;  %v26_v21 = vld [vmem:[%s551_s1 + $0x20] sm:$0xff] }
   0xf   :  { %290 = vmatprep.subr.mxu0 %v375_v1  ;;  %321 = vmatprep.subr.mxu1 %v375_v1  ;;  %v124_v22 = vld [vmem:[%s553_s3 + $0x30] sm:$0xff]  ;;  %v25_v23 = vld [vmem:[%s551_s1 + $0x18] sm:$0xff]  ;;  %v123_v24 = vld [vmem:[%s553_s3 + $0x28] sm:$0xff]  ;;  %vm213_vm2 = vcmp.lt.s32.totalorder %v212_v41, 8 }
  0x10   :  { %291 = vmatpush3.msra.mxu0 %v30_v13  ;;  %322 = vmatpush3.msra.mxu1 %v128_v14  ;;  %v24_v25 = vld [vmem:[%s551_s1 + $0x10] sm:$0xff]  ;;  %v122_v26 = vld [vmem:[%s553_s3 + $0x20] sm:$0xff]  ;;  %v23_v27 = vld [vmem:[%s551_s1 + $0x8] sm:$0xff] }
  0x11   :  { %292 = vmatprep.subr.mxu0 %v375_v1  ;;  %323 = vmatprep.subr.mxu1 %v375_v1  ;;  %v121_v28 = vld [vmem:[%s553_s3 + $0x18] sm:$0xff]  ;;  %v22_v29 = vld [vmem:[%s551_s1] sm:$0xff]  ;;  %v120_v31 = vld [vmem:[%s553_s3 + $0x10] sm:$0xff] }
  0x12   :  { %293 = vmatpush3.msra.mxu0 %v29_v15  ;;  %324 = vmatpush3.msra.mxu1 %v127_v16  ;;  %v21_v30 = vld [vmem:[%s550_s0] sm:$0xff]  ;;  %v119_v32 = vld [vmem:[%s553_s3 + $0x8] sm:$0xff] }
  0x13   :  { %294 = vmatprep.subr.mxu0 %v375_v1  ;;  %325 = vmatprep.subr.mxu1 %v375_v1  ;;  %v118_v33 = vld [vmem:[%s553_s3] sm:$0xff] }
  0x14   :  { %295 = vmatpush3.msra.mxu0 %v28_v17  ;;  %326 = vmatpush3.msra.mxu1 %v126_v18  ;;  %v240_v34 = vld [vmem:[%s552_s2] ss:$0 sm:$0xff]  ;;  %s377_s2 = smov [#allocation2]  }
  0x15   :  { %296 = vmatprep.subr.mxu0 %v375_v1  ;;  %327 = vmatprep.subr.mxu1 %v375_v1  ;;  %v241_v42 = vld [vmem:[%s554_s4] ss:$0 sm:$0xff]  ;;  %s232_s3 = sshll.u32 %s377_s2, 4  ;;  %s233_s3 = int_to_ptr.vmem [resolvable:$true] %s232_s3 }
  0x16   :  { %297 = vmatpush3.msra.mxu0 %v27_v19  ;;  %328 = vmatpush3.msra.mxu1 %v125_v20  ;;  %s353_s4 = scalar_lea.vmem %s233_s3, 128  ;;  %p358_p1 = scmp.lt.s32.totalorder %s233_s3, %s233_s3 }
  0x17   :  { %298 = vmatprep.subr.mxu0 %v375_v1  ;;  %329 = vmatprep.subr.mxu1 %v375_v1  ;;  %p354_p0 = scmp.ne.s32.totalorder %s233_s3, %s353_s4  ;;  %p359_p2 = scmp.lt.s32.totalorder %s353_s4, %s353_s4 }
  0x18   :  { %299 = vmatpush3.msra.mxu0 %v26_v21  ;;  %330 = vmatpush3.msra.mxu1 %v124_v22 }
  0x19   :  { %300 = vmatprep.subr.mxu0 %v375_v1  ;;  %331 = vmatprep.subr.mxu1 %v375_v1  ;;  %p360_p3 = por %p359_p2, %p358_p1 }
  0x1a   :  { %301 = vmatpush3.msra.mxu0 %v25_v23  ;;  %332 = vmatpush3.msra.mxu1 %v123_v24 }
  0x1b   :  { %302 = vmatprep.subr.mxu0 %v375_v1  ;;  %333 = vmatprep.subr.mxu1 %v375_v1  ;;  %p361_p4 = pnand %p360_p3, %p354_p0 }
  0x1c   :  { %303 = vmatpush3.msra.mxu0 %v24_v25  ;;  %334 = vmatpush3.msra.mxu1 %v122_v26 }
  0x1d   :  { %304 = vmatprep.subr.mxu0 %v375_v1  ;;  %335 = vmatprep.subr.mxu1 %v375_v1 }
  0x1e   :  { %305 = vmatpush3.msra.mxu0 %v23_v27  ;;  %336 = vmatpush3.msra.mxu1 %v121_v28 }
  0x1f   :  { %306 = vmatprep.subr.mxu0 %v375_v1  ;;  %337 = vmatprep.subr.mxu1 %v375_v1 }
  0x20   :  { %307 = vmatpush3.msra.mxu0 %v22_v29  ;;  %338 = vmatpush3.msra.mxu1 %v120_v31 }
  0x21   :  { %309 = vmatmul.mubr.f32.vlgmr.msra.gmra.mxu0 %v21_v30  ;;  %339 = vmatprep.subr.mxu1 %v375_v1 }
  0x22   :  { %340 = vmatpush3.msra.mxu1 %v119_v32 }
  0x23   :  { %341 = vmatprep.subr.mxu1 %v375_v1 }
  0x24   :  { %342 = vmatpush3.msra.mxu1 %v118_v33 }
  0xe1   :  { %v111_v35 = vpop.f32.mrf.mxu0 }
  0xe2   :  { %v112_v36 = vadd.f32 %v240_v34, %v111_v35 }
  0xe3   :  { %v310_v37 = vpop.f32.mrf.mxu0 }
  0xe4   :  { %v116_v38 = vmul.f32 0.01, %v112_v36  ;;  %vm115_vm1 = vcmp.gt.f32.partialorder %v112_v36, 0.0 }
  0xe6   :  { %v117_v39 = vsel %vm115_vm1, %v112_v36, %v116_v38 }
  0xe7   :  { %344 = vmatmul.mubr.f32.vlgmr.msra.gmra.mxu1 %v117_v39 }
 0x1a7   :  { %v207_v43 = vpop.f32.mrf.mxu1 }
 0x1a8   :  { %v208_v44 = vadd.f32 %v241_v42, %v207_v43 }
 0x1a9   :  { %v345_v45 = vpop.f32.mrf.mxu1 }
 0x1aa   :  { %v214_v46 = vsel %vm213_vm2, %v208_v44, -1e+30 }
 0x1ab   :  { %215 = vmax.xlane.f32.xlu0 %v214_v46 }
 0x234   :  { %v216_v47 = vpop.xlane.xlu0 %215 }
 0x235   :  { %v217_v48 = vsub.f32 %v214_v46, %v216_v47 }
 0x237   :  { %v218_v49 = vmul.f32 1.442695, %v217_v48 }
 0x239   :  { %349 = vpow2.f32 %v218_v49 }
 0x246   :  { %v350_v50 = vpop.eup %349 }
 0x247   :  { %220 = vadd.xlane.f32.xlu0 %v350_v50 }
 0x2d0   :  { %v221_v51 = vpop.xlane.xlu0 %220 }
 0x2d1   :  { %351 = vlog2.f32 %v221_v51 }
 0x2de   :  { %v352_v52 = vpop.eup %351 }
 0x2df   :  { %v223_v53 = vmul.f32 0.6931472, %v352_v52 }
 0x2e1   :  { %v224_v54 = vsub.f32 %v217_v48, %v223_v53 }
 0x2e3   :  { %225 = vst [vmem:[#allocation2] sm:$0xff] %v224_v54 }
 0x2e4   :  { %364 = shalt.err (!%p361_p4)
}
 0x2e5   :  { %235 = dma.vmem_to_hbm [thread:$0]  %s233_s3, 128, %s555_s5, [#allocation3]  }
 0x2e6   :  { %373 = dma.done.wait [#allocation3], 128  }
 0x2e7   :  { %374 = vsyncadd [#allocation3], 4294967168 }
 0x2e8   :  { %239 = vsyncpa [#allocation3], 1 }

</bundles_post_ra>
